<compile_context>
chip_gen: v7x
topology: tpu7x:2x2x1
jax: 0.10.0
libtpu: 0.0.40
codegen_flags: <defaults>
</compile_context>

<pallas_src>
import math

import jax
import jax.numpy as jnp
from jax import lax
from jax.experimental import pallas as pl
from jax.experimental.pallas import tpu as pltpu

_HALF_LOG_2PI = 0.5 * math.log(2.0 * math.pi)

# MLP matmul operand dtype (accumulation is always f32).
MATMUL_DTYPE = jnp.bfloat16


def _round_up(x, m):
    return ((x + m - 1) // m) * m


# ---------------------------------------------------------------------------
# Kernel
# ---------------------------------------------------------------------------
def _actor_critic_kernel(s_ref, a_ref, w1_ref, b1_ref, w2_ref, b2_ref,
                         w3_ref, b3_ref, coef_ref, out_ref):
    f32 = jnp.float32
    mm = w1_ref.dtype                                     # matmul operand dtype

    x = s_ref[...]                                        # (TB, S) f32

    # Layer 1: fused actor|critic columns (shared state input, no zero blocks).
    h1 = jnp.dot(x.astype(mm), w1_ref[...], preferred_element_type=f32) + b1_ref[...]
    h1 = jnp.maximum(h1, 0.0)                             # (TB, 512)

    # Layers 2/3: separate actor / critic matmuls (no block-diagonal zeros, so
    # v5e's 128x128 MXUs never process wasted tiles; same passes on v6e/v7x).
    H1 = w2_ref.shape[1]                                  # 256
    ha = jnp.maximum(jnp.dot(h1[:, :H1].astype(mm), w2_ref[0],
                             preferred_element_type=f32) + b2_ref[0], 0.0)  # (TB,128)
    hc = jnp.maximum(jnp.dot(h1[:, H1:].astype(mm), w2_ref[1],
                             preferred_element_type=f32) + b2_ref[1], 0.0)  # (TB,128)
    ya = jnp.dot(ha.astype(mm), w3_ref[0], preferred_element_type=f32) + b3_ref[0]
    yc = jnp.dot(hc.astype(mm), w3_ref[1], preferred_element_type=f32) + b3_ref[1]

    A = a_ref.shape[-1]
    mean = jnp.tanh(ya[:, :A])            # EUP only on the A real actor columns
    d = a_ref[...] - mean                                 # (TB, A) f32

    # One small f32 MXU matmul performs the sum over actions, the
    # (TB,1)->(1,TB) transpose AND the row packing into the lane-dense output:
    #   out(8, TB) = coef(8, A+2) . u(TB, A+2)^T
    # coef row 0 = [-0.5/sigma^2 ..., 0, lp_const]   -> log_prob
    # coef row 1 = [0 ..., 1, 0]                     -> value passthrough
    # coef row 2 = [0 ..., 0, entropy_sum]           -> entropy
    # rows 3-7 = 0 (padding).
    tb = d.shape[0]
    u = jnp.concatenate([d * d, yc[:, 0:1], jnp.ones((tb, 1), f32)], axis=1)
    out_ref[...] = lax.dot_general(
        coef_ref[...], u,
        dimension_numbers=(((1,), (1,)), ((), ())),       # contract last dims (q.k^T form)
        preferred_element_type=f32)


# ---------------------------------------------------------------------------
# Parameters
# ---------------------------------------------------------------------------
def init_params(key, state_size, action_size):
    """PyTorch nn.Linear-style uniform(-1/sqrt(fan_in), ...) init; weights are (in, out)."""
    dims = {"a": [(state_size, 256), (256, 128), (128, action_size)],
            "c": [(state_size, 256), (256, 128), (128, 1)]}
    params = {}
    keys = jax.random.split(key, 12)
    k = 0
    for name, layer_dims in dims.items():
        for li, (fin, fout) in enumerate(layer_dims, start=1):
            bound = 1.0 / math.sqrt(fin)
            params[f"{name}w{li}"] = jax.random.uniform(
                keys[k], (fin, fout), jnp.float32, -bound, bound)
            params[f"{name}b{li}"] = jax.random.uniform(
                keys[k + 1], (1, fout), jnp.float32, -bound, bound)
            k += 2
    params["std"] = jnp.zeros((1, action_size), jnp.float32)   # nn.Parameter(zeros)
    return params


def prepare_fused_params(params, matmul_dtype=MATMUL_DTYPE):
    """Fused layer-1 weights, stacked per-head layer-2/3 weights, packing coefs."""
    H2, HEAD = 128, 128
    A = params["aw3"].shape[1]

    w1 = jnp.concatenate([params["aw1"], params["cw1"]], axis=1)        # (S, 512)
    b1 = jnp.concatenate([params["ab1"], params["cb1"]], axis=1)        # (1, 512)
    w2 = jnp.stack([params["aw2"], params["cw2"]], axis=0)              # (2, 256, 128)
    b2 = jnp.stack([params["ab2"], params["cb2"]], axis=0)              # (2, 1, 128)

    # Layer-3 heads padded to 128 lane-dense output columns (padding stays zero).
    aw3 = jnp.zeros((H2, HEAD), jnp.float32).at[:, :A].set(params["aw3"])
    cw3 = jnp.zeros((H2, HEAD), jnp.float32).at[:, :1].set(params["cw3"])
    ab3 = jnp.zeros((1, HEAD), jnp.float32).at[:, :A].set(params["ab3"])
    cb3 = jnp.zeros((1, HEAD), jnp.float32).at[:, :1].set(params["cb3"])
    w3 = jnp.stack([aw3, cw3], axis=0)                                  # (2, 128, 128)
    b3 = jnp.stack([ab3, cb3], axis=0)                                  # (2, 1, 128)

    # Stable softplus; precompute everything that only depends on std.
    sigma = jax.nn.softplus(params["std"])[0]                           # (A,)
    sigma = jnp.maximum(sigma, jnp.finfo(jnp.float32).tiny)
    log_sigma = jnp.log(sigma)
    lp_const = -(jnp.sum(log_sigma) + A * _HALF_LOG_2PI)
    ent_sum = jnp.sum(0.5 + _HALF_LOG_2PI + log_sigma)

    # coef rows map u = [ d^2 (A cols) | value | 1 ] -> [log_prob, value, entropy, 0...]
    coef = jnp.zeros((8, A + 2), jnp.float32)
    coef = coef.at[0, :A].set(-0.5 / (sigma * sigma))
    coef = coef.at[0, A + 1].set(lp_const)
    coef = coef.at[1, A].set(1.0)
    coef = coef.at[2, A + 1].set(ent_sum)

    return {"w1": w1.astype(matmul_dtype), "b1": b1,
            "w2": w2.astype(matmul_dtype), "b2": b2,
            "w3": w3.astype(matmul_dtype), "b3": b3,
            "coef": coef}


# ---------------------------------------------------------------------------
# Wrapper (equivalent of ActorCritic.evaluate)
# ---------------------------------------------------------------------------
def actor_critic_evaluate(state, action, fused, *, tile_b=512):
    """evaluate(state, action) -> (log_prob (B,), value (B,), entropy (B,))."""
    B, S = state.shape
    A = action.shape[1]
    F1 = fused["w1"].shape[1]          # 512
    H1 = fused["w2"].shape[1]          # 256
    H2 = fused["w3"].shape[1]          # 128
    HEAD = fused["w3"].shape[2]        # 128
    K = fused["coef"].shape[1]         # A + 2

    tile_b = max(_round_up(tile_b, 128), 128)
    if B > tile_b:
        # Large batch: <= tile_b rows per tile, grid length >= 2 (v7x megacore).
        TILE_B = min(tile_b, _round_up(-(-B // 2), 128))
    elif B >= 256:
        # Medium batch: split into two tiles so both v7x TensorCores get work.
        TILE_B = _round_up(-(-B // 2), 128)
    else:
        # Small batch: a single minimal tile.
        TILE_B = _round_up(max(B, 1), 8)

    padded_B = _round_up(B, TILE_B)
    if padded_B != B:
        pad = padded_B - B
        state = jnp.pad(state, ((0, pad), (0, 0)))
        action = jnp.pad(action, ((0, pad), (0, 0)))
    grid = (padded_B // TILE_B,)

    weight_bytes = sum(int(v.size) * v.dtype.itemsize for v in fused.values())
    cost = pl.CostEstimate(
        flops=int(2 * padded_B * (S * F1 + 2 * H1 * H2 + 2 * H2 * HEAD + 8 * K)
                  + 10 * padded_B * (F1 + 2 * H2 + A)),
        transcendentals=int(padded_B * A),
        bytes_accessed=int(state.nbytes + action.nbytes + weight_bytes
                           + 8 * padded_B * 4),
    )

    out = pl.pallas_call(
        _actor_critic_kernel,
        out_shape=jax.ShapeDtypeStruct((8, padded_B), jnp.float32),
        grid=grid,
        in_specs=[
            pl.BlockSpec((TILE_B, S), lambda i: (i, 0)),      # state  (batch-tiled)
            pl.BlockSpec((TILE_B, A), lambda i: (i, 0)),      # action (batch-tiled)
            pl.BlockSpec((S, F1), lambda i: (0, 0)),          # w1 (resident)
            pl.BlockSpec((1, F1), lambda i: (0, 0)),          # b1
            pl.BlockSpec((2, H1, H2), lambda i: (0, 0, 0)),   # w2 [actor, critic]
            pl.BlockSpec((2, 1, H2), lambda i: (0, 0, 0)),    # b2
            pl.BlockSpec((2, H2, HEAD), lambda i: (0, 0, 0)), # w3 [actor, critic]
            pl.BlockSpec((2, 1, HEAD), lambda i: (0, 0, 0)),  # b3
            pl.BlockSpec((8, K), lambda i: (0, 0)),           # packing coefficients
        ],
        # Transposed stats-on-sublanes output: lane-dense (TILE_B lanes) blocks.
        out_specs=pl.BlockSpec((8, TILE_B), lambda i: (0, i)),
        compiler_params=pltpu.CompilerParams(
            dimension_semantics=("parallel",)),               # v7x: 2 TCs share the grid
        cost_estimate=cost,
    )(state, action,
      fused["w1"], fused["b1"], fused["w2"], fused["b2"],
      fused["w3"], fused["b3"], fused["coef"])

    return out[0, :B], out[1, :B], out[2, :B]


# ---------------------------------------------------------------------------
# Pure-JAX reference (same bf16 matmul-operand precision as the kernel)
# ---------------------------------------------------------------------------
def _reference(state, action, p, matmul_dtype=MATMUL_DTYPE):
    def dense(x, w, b):
        return jnp.dot(x.astype(matmul_dtype), w.astype(matmul_dtype),
                       preferred_element_type=jnp.float32) + b

    def mlp(x, w1, b1, w2, b2, w3, b3):
        h = jnp.maximum(dense(x, w1, b1), 0.0)
        h = jnp.maximum(dense(h, w2, b2), 0.0)
        return dense(h, w3, b3)

    mean = jnp.tanh(mlp(state, p["aw1"], p["ab1"], p["aw2"], p["ab2"],
                        p["aw3"], p["ab3"]))
    value = mlp(state, p["cw1"], p["cb1"], p["cw2"], p["cb2"],
                p["cw3"], p["cb3"])[:, 0]
    sigma = jax.nn.softplus(p["std"])
    lp = (-0.5 * ((action - mean) / sigma) ** 2
          - jnp.log(sigma) - _HALF_LOG_2PI).sum(-1)
    ent = jnp.broadcast_to((0.5 + _HALF_LOG_2PI + jnp.log(sigma)).sum(-1), lp.shape)
    return lp, value, ent


if __name__ == "__main__":
    STATE_SIZE, ACTION_SIZE = 32, 4

    key = jax.random.PRNGKey(0)
    kp, ks, ka = jax.random.split(key, 3)
    params = init_params(kp, STATE_SIZE, ACTION_SIZE)
    fused = prepare_fused_params(params)

    # Check both the single-tile path (small B) and the multi-tile path (grid=2).
    for B in (8, 300):
        kb = jax.random.fold_in(ks, B)
        ka_b = jax.random.fold_in(ka, B)
        states = jax.random.normal(kb, (B, STATE_SIZE), jnp.float32)
        actions = jax.random.normal(ka_b, (B, ACTION_SIZE), jnp.float32)

        log_prob, value, entropy = actor_critic_evaluate(states, actions, fused)
        jax.block_until_ready((log_prob, value, entropy))

        ref_lp, ref_v, ref_e = _reference(states, actions, params)
        assert jnp.allclose(log_prob, ref_lp, atol=2e-3, rtol=2e-3), f"log_prob mismatch B={B}"
        assert jnp.allclose(value, ref_v, atol=2e-3, rtol=2e-3), f"value mismatch B={B}"
        assert jnp.allclose(entropy, ref_e, atol=2e-3, rtol=2e-3), f"entropy mismatch B={B}"

    # TODO(synk): act() (Normal sampling + memory writes) is host/XLA-side RL
    # plumbing and is intentionally not implemented as a kernel.
    print("KERNEL_OK")
</pallas_src>

<mosaic_0001>
module attributes {stable_mosaic.version = 11 : i64} {
  func.func @_actor_critic_kernel(%arg0: i32, %arg1: memref<8x32xf32, #tpu.memory_space<vmem>>, %arg2: memref<8x4xf32, #tpu.memory_space<vmem>>, %arg3: memref<32x512xbf16, #tpu.memory_space<vmem>>, %arg4: memref<1x512xf32, #tpu.memory_space<vmem>>, %arg5: memref<2x256x128xbf16, #tpu.memory_space<vmem>>, %arg6: memref<2x1x128xf32, #tpu.memory_space<vmem>>, %arg7: memref<2x128x128xbf16, #tpu.memory_space<vmem>>, %arg8: memref<2x1x128xf32, #tpu.memory_space<vmem>>, %arg9: memref<8x6xf32, #tpu.memory_space<vmem>>, %arg10: memref<8x8xf32, #tpu.memory_space<vmem>>) attributes {dimension_semantics = [#tpu.dimension_semantics<parallel>], iteration_bounds = array<i64: 1>, scalar_prefetch = 0 : i64, scratch_operands = 0 : i64, tpu.core_type = #tpu.core_type<tc>, window_params = [{transform_indices = @transform_0, window_bounds = array<i64: 8, 32>}, {transform_indices = @transform_1, window_bounds = array<i64: 8, 4>}, {pipeline_mode = #tpu.pipeline_mode<synchronous>, transform_indices = @transform_2, window_bounds = array<i64: 32, 512>}, {pipeline_mode = #tpu.pipeline_mode<synchronous>, transform_indices = @transform_3, window_bounds = array<i64: 1, 512>}, {pipeline_mode = #tpu.pipeline_mode<synchronous>, transform_indices = @transform_4, window_bounds = array<i64: 2, 256, 128>}, {pipeline_mode = #tpu.pipeline_mode<synchronous>, transform_indices = @transform_5, window_bounds = array<i64: 2, 1, 128>}, {pipeline_mode = #tpu.pipeline_mode<synchronous>, transform_indices = @transform_6, window_bounds = array<i64: 2, 128, 128>}, {pipeline_mode = #tpu.pipeline_mode<synchronous>, transform_indices = @transform_7, window_bounds = array<i64: 2, 1, 128>}, {pipeline_mode = #tpu.pipeline_mode<synchronous>, transform_indices = @transform_8, window_bounds = array<i64: 8, 6>}, {transform_indices = @transform_9, window_bounds = array<i64: 8, 8>}]} {
    %c0 = arith.constant 0 : index
    %c0_0 = arith.constant 0 : index
    %0 = vector.load %arg1[%c0, %c0_0] : memref<8x32xf32, #tpu.memory_space<vmem>>, vector<8x32xf32>
    %1 = arith.truncf %0 : vector<8x32xf32> to vector<8x32xbf16>
    %c0_1 = arith.constant 0 : index
    %c0_2 = arith.constant 0 : index
    %2 = vector.load %arg3[%c0_1, %c0_2] : memref<32x512xbf16, #tpu.memory_space<vmem>>, vector<32x512xbf16>
    %cst = arith.constant dense<0.000000e+00> : vector<8x512xf32>
    %3 = tpu.matmul %1, %2, %cst {dimension_numbers = #tpu.dot_dimension_numbers<[1], [0], [0], [1], [0, 0, 1, 1], [], []>} : vector<8x32xbf16>, vector<32x512xbf16>, vector<8x512xf32> -> vector<8x512xf32>
    %c0_3 = arith.constant 0 : index
    %c0_4 = arith.constant 0 : index
    %4 = vector.load %arg4[%c0_3, %c0_4] : memref<1x512xf32, #tpu.memory_space<vmem>>, vector<1x512xf32>
    %5 = vector.broadcast %4 : vector<1x512xf32> to vector<8x512xf32>
    %6 = arith.addf %3, %5 : vector<8x512xf32>
    %cst_5 = arith.constant 0.000000e+00 : f32
    %7 = vector.broadcast %cst_5 : f32 to vector<8x512xf32>
    %8 = arith.maximumf %6, %7 : vector<8x512xf32>
    %9 = vector.extract_strided_slice %8 {offsets = [0, 0], sizes = [8, 256], strides = [1, 1]} : vector<8x512xf32> to vector<8x256xf32>
    %10 = arith.truncf %9 : vector<8x256xf32> to vector<8x256xbf16>
    %c0_6 = arith.constant 0 : index
    %c0_7 = arith.constant 0 : index
    %c0_8 = arith.constant 0 : index
    %11 = vector.load %arg5[%c0_6, %c0_7, %c0_8] : memref<2x256x128xbf16, #tpu.memory_space<vmem>>, vector<1x256x128xbf16>
    %12 = vector.shape_cast %11 : vector<1x256x128xbf16> to vector<256x128xbf16>
    %cst_9 = arith.constant dense<0.000000e+00> : vector<8x128xf32>
    %13 = tpu.matmul %10, %12, %cst_9 {dimension_numbers = #tpu.dot_dimension_numbers<[1], [0], [0], [1], [0, 0, 1, 1], [], []>} : vector<8x256xbf16>, vector<256x128xbf16>, vector<8x128xf32> -> vector<8x128xf32>
    %c0_10 = arith.constant 0 : index
    %c0_11 = arith.constant 0 : index
    %c0_12 = arith.constant 0 : index
    %14 = vector.load %arg6[%c0_10, %c0_11, %c0_12] : memref<2x1x128xf32, #tpu.memory_space<vmem>>, vector<1x1x128xf32>
    %15 = vector.shape_cast %14 : vector<1x1x128xf32> to vector<1x128xf32>
    %16 = vector.broadcast %15 : vector<1x128xf32> to vector<8x128xf32>
    %17 = arith.addf %13, %16 : vector<8x128xf32>
    %cst_13 = arith.constant 0.000000e+00 : f32
    %18 = vector.broadcast %cst_13 : f32 to vector<8x128xf32>
    %19 = arith.maximumf %17, %18 : vector<8x128xf32>
    %20 = vector.extract_strided_slice %8 {offsets = [0, 256], sizes = [8, 256], strides = [1, 1]} : vector<8x512xf32> to vector<8x256xf32>
    %21 = arith.truncf %20 : vector<8x256xf32> to vector<8x256xbf16>
    %c1 = arith.constant 1 : index
    %c0_14 = arith.constant 0 : index
    %c0_15 = arith.constant 0 : index
    %22 = vector.load %arg5[%c1, %c0_14, %c0_15] : memref<2x256x128xbf16, #tpu.memory_space<vmem>>, vector<1x256x128xbf16>
    %23 = vector.shape_cast %22 : vector<1x256x128xbf16> to vector<256x128xbf16>
    %cst_16 = arith.constant dense<0.000000e+00> : vector<8x128xf32>
    %24 = tpu.matmul %21, %23, %cst_16 {dimension_numbers = #tpu.dot_dimension_numbers<[1], [0], [0], [1], [0, 0, 1, 1], [], []>} : vector<8x256xbf16>, vector<256x128xbf16>, vector<8x128xf32> -> vector<8x128xf32>
    %c1_17 = arith.constant 1 : index
    %c0_18 = arith.constant 0 : index
    %c0_19 = arith.constant 0 : index
    %25 = vector.load %arg6[%c1_17, %c0_18, %c0_19] : memref<2x1x128xf32, #tpu.memory_space<vmem>>, vector<1x1x128xf32>
    %26 = vector.shape_cast %25 : vector<1x1x128xf32> to vector<1x128xf32>
    %27 = vector.broadcast %26 : vector<1x128xf32> to vector<8x128xf32>
    %28 = arith.addf %24, %27 : vector<8x128xf32>
    %cst_20 = arith.constant 0.000000e+00 : f32
    %29 = vector.broadcast %cst_20 : f32 to vector<8x128xf32>
    %30 = arith.maximumf %28, %29 : vector<8x128xf32>
    %31 = arith.truncf %19 : vector<8x128xf32> to vector<8x128xbf16>
    %c0_21 = arith.constant 0 : index
    %c0_22 = arith.constant 0 : index
    %c0_23 = arith.constant 0 : index
    %32 = vector.load %arg7[%c0_21, %c0_22, %c0_23] : memref<2x128x128xbf16, #tpu.memory_space<vmem>>, vector<1x128x128xbf16>
    %33 = vector.shape_cast %32 : vector<1x128x128xbf16> to vector<128x128xbf16>
    %cst_24 = arith.constant dense<0.000000e+00> : vector<8x128xf32>
    %34 = tpu.matmul %31, %33, %cst_24 {dimension_numbers = #tpu.dot_dimension_numbers<[1], [0], [0], [1], [0, 0, 1, 1], [], []>} : vector<8x128xbf16>, vector<128x128xbf16>, vector<8x128xf32> -> vector<8x128xf32>
    %c0_25 = arith.constant 0 : index
    %c0_26 = arith.constant 0 : index
    %c0_27 = arith.constant 0 : index
    %35 = vector.load %arg8[%c0_25, %c0_26, %c0_27] : memref<2x1x128xf32, #tpu.memory_space<vmem>>, vector<1x1x128xf32>
    %36 = vector.shape_cast %35 : vector<1x1x128xf32> to vector<1x128xf32>
    %37 = vector.broadcast %36 : vector<1x128xf32> to vector<8x128xf32>
    %38 = arith.addf %34, %37 : vector<8x128xf32>
    %39 = arith.truncf %30 : vector<8x128xf32> to vector<8x128xbf16>
    %c1_28 = arith.constant 1 : index
    %c0_29 = arith.constant 0 : index
    %c0_30 = arith.constant 0 : index
    %40 = vector.load %arg7[%c1_28, %c0_29, %c0_30] : memref<2x128x128xbf16, #tpu.memory_space<vmem>>, vector<1x128x128xbf16>
    %41 = vector.shape_cast %40 : vector<1x128x128xbf16> to vector<128x128xbf16>
    %cst_31 = arith.constant dense<0.000000e+00> : vector<8x128xf32>
    %42 = tpu.matmul %39, %41, %cst_31 {dimension_numbers = #tpu.dot_dimension_numbers<[1], [0], [0], [1], [0, 0, 1, 1], [], []>} : vector<8x128xbf16>, vector<128x128xbf16>, vector<8x128xf32> -> vector<8x128xf32>
    %c1_32 = arith.constant 1 : index
    %c0_33 = arith.constant 0 : index
    %c0_34 = arith.constant 0 : index
    %43 = vector.load %arg8[%c1_32, %c0_33, %c0_34] : memref<2x1x128xf32, #tpu.memory_space<vmem>>, vector<1x1x128xf32>
    %44 = vector.shape_cast %43 : vector<1x1x128xf32> to vector<1x128xf32>
    %45 = vector.broadcast %44 : vector<1x128xf32> to vector<8x128xf32>
    %46 = arith.addf %42, %45 : vector<8x128xf32>
    %47 = vector.extract_strided_slice %38 {offsets = [0, 0], sizes = [8, 4], strides = [1, 1]} : vector<8x128xf32> to vector<8x4xf32>
    %48 = math.tanh %47 : vector<8x4xf32>
    %c0_35 = arith.constant 0 : index
    %c0_36 = arith.constant 0 : index
    %49 = vector.load %arg2[%c0_35, %c0_36] : memref<8x4xf32, #tpu.memory_space<vmem>>, vector<8x4xf32>
    %50 = arith.subf %49, %48 : vector<8x4xf32>
    %51 = arith.mulf %50, %50 : vector<8x4xf32>
    %52 = vector.extract_strided_slice %46 {offsets = [0, 0], sizes = [8, 1], strides = [1, 1]} : vector<8x128xf32> to vector<8x1xf32>
    %cst_37 = arith.constant 1.000000e+00 : f32
    %53 = vector.broadcast %cst_37 : f32 to vector<8x1xf32>
    %54 = tpu.concatenate %51, %52, %53 in 1 : vector<8x4xf32>, vector<8x1xf32>, vector<8x1xf32> -> vector<8x6xf32>
    %c0_38 = arith.constant 0 : index
    %c0_39 = arith.constant 0 : index
    %55 = vector.load %arg9[%c0_38, %c0_39] : memref<8x6xf32, #tpu.memory_space<vmem>>, vector<8x6xf32>
    %cst_40 = arith.constant dense<0.000000e+00> : vector<8x8xf32>
    %56 = tpu.matmul %55, %54, %cst_40 {dimension_numbers = #tpu.dot_dimension_numbers<[1], [1], [0], [0], [0, 0, 1, 0], [], []>} : vector<8x6xf32>, vector<8x6xf32>, vector<8x8xf32> -> vector<8x8xf32>
    %c0_41 = arith.constant 0 : index
    %c0_42 = arith.constant 0 : index
    %57 = vector.load %arg10[%c0_41, %c0_42] : memref<8x8xf32, #tpu.memory_space<vmem>>, vector<8x8xf32>
    tpu.vector_store %arg10[%c0_41, %c0_42], %56 {strides = array<i32>} : memref<8x8xf32, #tpu.memory_space<vmem>>, vector<8x8xf32>,
    return
  }
  func.func @transform_0(%arg0: i32) -> (i32, i32) {
    %c0_i32 = arith.constant 0 : i32
    %c0_i32_0 = arith.constant 0 : i32
    return %arg0, %c0_i32 : i32, i32
  }
  func.func @transform_1(%arg0: i32) -> (i32, i32) {
    %c0_i32 = arith.constant 0 : i32
    %c0_i32_0 = arith.constant 0 : i32
    return %arg0, %c0_i32 : i32, i32
  }
  func.func @transform_2(%arg0: i32) -> (i32, i32) {
    %c0_i32 = arith.constant 0 : i32
    %c0_i32_0 = arith.constant 0 : i32
    %c0_i32_1 = arith.constant 0 : i32
    return %c0_i32, %c0_i32_0 : i32, i32
  }
  func.func @transform_3(%arg0: i32) -> (i32, i32) {
    %c0_i32 = arith.constant 0 : i32
    %c0_i32_0 = arith.constant 0 : i32
    %c0_i32_1 = arith.constant 0 : i32
    return %c0_i32, %c0_i32_0 : i32, i32
  }
  func.func @transform_4(%arg0: i32) -> (i32, i32, i32) {
    %c0_i32 = arith.constant 0 : i32
    %c0_i32_0 = arith.constant 0 : i32
    %c0_i32_1 = arith.constant 0 : i32
    %c0_i32_2 = arith.constant 0 : i32
    return %c0_i32, %c0_i32_0, %c0_i32_1 : i32, i32, i32
  }
  func.func @transform_5(%arg0: i32) -> (i32, i32, i32) {
    %c0_i32 = arith.constant 0 : i32
    %c0_i32_0 = arith.constant 0 : i32
    %c0_i32_1 = arith.constant 0 : i32
    %c0_i32_2 = arith.constant 0 : i32
    return %c0_i32, %c0_i32_0, %c0_i32_1 : i32, i32, i32
  }
  func.func @transform_6(%arg0: i32) -> (i32, i32, i32) {
    %c0_i32 = arith.constant 0 : i32
    %c0_i32_0 = arith.constant 0 : i32
    %c0_i32_1 = arith.constant 0 : i32
    %c0_i32_2 = arith.constant 0 : i32
    return %c0_i32, %c0_i32_0, %c0_i32_1 : i32, i32, i32
  }
  func.func @transform_7(%arg0: i32) -> (i32, i32, i32) {
    %c0_i32 = arith.constant 0 : i32
    %c0_i32_0 = arith.constant 0 : i32
    %c0_i32_1 = arith.constant 0 : i32
    %c0_i32_2 = arith.constant 0 : i32
    return %c0_i32, %c0_i32_0, %c0_i32_1 : i32, i32, i32
  }
  func.func @transform_8(%arg0: i32) -> (i32, i32) {
    %c0_i32 = arith.constant 0 : i32
    %c0_i32_0 = arith.constant 0 : i32
    %c0_i32_1 = arith.constant 0 : i32
    return %c0_i32, %c0_i32_0 : i32, i32
  }
  func.func @transform_9(%arg0: i32) -> (i32, i32) {
    %c0_i32 = arith.constant 0 : i32
    %c0_i32_0 = arith.constant 0 : i32
    return %c0_i32, %arg0 : i32, i32
  }
}

</mosaic_0001>

<bundles_post_ra>
// kernel: tpu_custom_call.1
= control target key start
LH: loop header
LB: loop body
LE: loop exit
PB: predicated region body
PF: predicated region fallthrough
CT: control target
= control target key end

     0   :  { %14 = vsyncpa [#allocation3], 0  ;;  %s1434_s0 = inlined_call_operand.vmem [shape: f32[8,32], index: 0, kind: input, shape index: {}]   ;;  %s1435_s1 = inlined_call_operand.vmem [shape: f32[8,4], index: 1, kind: input, shape index: {}]   ;;  %s1436_s2 = inlined_call_operand.hbm [shape: bf16[32,512], index: 2, kind: input, shape index: {}]   ;;  %s1437_s3 = inlined_call_operand.vmem [shape: f32[1,512], index: 3, kind: input, shape index: {}]   ;;  %s1438_s4 = inlined_call_operand.hbm [shape: bf16[2,256,128], index: 4, kind: input, shape index: {}]   ;;  %s1439_s5 = inlined_call_operand.vmem [shape: f32[2,1,128], index: 5, kind: input, shape index: {}]   ;;  %s1440_s6 = inlined_call_operand.hbm [shape: bf16[2,128,128], index: 6, kind: input, shape index: {}]   ;;  %s1441_s7 = inlined_call_operand.vmem [shape: f32[2,1,128], index: 7, kind: input, shape index: {}]   ;;  %s1442_s8 = inlined_call_operand.vmem [shape: f32[8,6], index: 8, kind: input, shape index: {}]   ;;  %s1443_s9 = inlined_call_operand.hbm [shape: f32[8,8], index: 9, kind: output, shape index: {}]  }
   0x1   :  { %15 = vsyncpa [#allocation6], 0 }
   0x2   :  { %16 = vsyncpa [#allocation4], 0  ;;  %s1271_s30 = smov [#allocation5]   ;;  %s1177_s13 = scalar_lea.hbm %s1438_s4, 4096 }
   0x3   :  { %s40_s10 = sshll.u32 %s1271_s30, 4  ;;  %p1178_p0 = scmp.ne.s32.totalorder %s1438_s4, %s1177_s13  ;;  %s41_s10 = int_to_ptr.vmem [resolvable:$true] %s40_s10 }
   0x4   :  { %p1181_p1 = scmp.lt.u32.totalorder %s1177_s13, %s1438_s4 }
   0x6   :  { %p1183_p2 = pnand %p1181_p1, %p1178_p0 }
   0x8   :  { %1186 = shalt.err (!%p1183_p2)
}
   0x9   :  { %s1187_s18 = scalar_lea.vmem %s41_s10, 4096  ;;  %p1192_p4 = scmp.lt.s32.totalorder %s41_s10, %s41_s10 }
   0xa   :  { %p1188_p3 = scmp.ne.s32.totalorder %s41_s10, %s1187_s18  ;;  %p1193_p5 = scmp.lt.s32.totalorder %s1187_s18, %s1187_s18 }
   0xc   :  { %p1194_p6 = por %p1193_p5, %p1192_p4 }
   0xe   :  { %p1195_p7 = pnand %p1194_p6, %p1188_p3 }
  0x10   :  { %1198 = shalt.err (!%p1195_p7)
}
  0x11   :  { %s1272_s19 = smov 64   ;;  %s1273_s20 = smov 4  }
  0x12   :  { %46 = dma.hbm_to_vmem [thread:$0]  %s1438_s4, 4096, %s41_s10, [#allocation6], %s1272_s19, %s1272_s19, %s1273_s20  }
  0x13   :  { %s1274_s23 = smov [#allocation2]   ;;  %s1199_s27 = scalar_lea.hbm %s1436_s2, 1024 }
  0x14   :  { %s26_s24 = sshll.u32 %s1274_s23, 4  ;;  %p1200_p8 = scmp.ne.s32.totalorder %s1436_s2, %s1199_s27  ;;  %s27_s24 = int_to_ptr.vmem [resolvable:$true] %s26_s24 }
  0x15   :  { %p1203_p9 = scmp.lt.u32.totalorder %s1199_s27, %s1436_s2 }
  0x17   :  { %p1205_p10 = pnand %p1203_p9, %p1200_p8 }
  0x19   :  { %1208 = shalt.err (!%p1205_p10)
}
  0x1a   :  { %s1209_s12 = scalar_lea.vmem %s27_s24, 1024  ;;  %p1214_p12 = scmp.lt.s32.totalorder %s27_s24, %s27_s24 }
  0x1b   :  { %p1210_p11 = scmp.ne.s32.totalorder %s27_s24, %s1209_s12  ;;  %p1215_p13 = scmp.lt.s32.totalorder %s1209_s12, %s1209_s12 }
  0x1d   :  { %p1216_p0 = por %p1215_p13, %p1214_p12 }
  0x1f   :  { %p1217_p1 = pnand %p1216_p0, %p1210_p11 }
  0x21   :  { %1220 = shalt.err (!%p1217_p1)
}
  0x22   :  { %s1275_s4 = smov 256   ;;  %s1276_s10 = smov 16  }
  0x23   :  { %32 = dma.hbm_to_vmem [thread:$0]  %s1436_s2, 1024, %s27_s24, [#allocation3], %s1275_s4, %s1275_s4, %s1276_s10  }
  0x24   :  { %s1277_s15 = smov [#allocation7]   ;;  %s1221_s21 = scalar_lea.hbm %s1440_s6, 2048 }
  0x25   :  { %s54_s16 = sshll.u32 %s1277_s15, 4  ;;  %p1222_p2 = scmp.ne.s32.totalorder %s1440_s6, %s1221_s21  ;;  %s55_s16 = int_to_ptr.vmem [resolvable:$true] %s54_s16 }
  0x26   :  { %p1225_p3 = scmp.lt.u32.totalorder %s1221_s21, %s1440_s6 }
  0x28   :  { %p1227_p4 = pnand %p1225_p3, %p1222_p2 }
  0x2a   :  { %1230 = shalt.err (!%p1227_p4)
}
  0x2b   :  { %s1231_s27 = scalar_lea.vmem %s55_s16, 2048  ;;  %p1236_p6 = scmp.lt.s32.totalorder %s55_s16, %s55_s16 }
  0x2c   :  { %p1232_p5 = scmp.ne.s32.totalorder %s55_s16, %s1231_s27  ;;  %p1237_p7 = scmp.lt.s32.totalorder %s1231_s27, %s1231_s27 }
  0x2e   :  { %p1238_p8 = por %p1237_p7, %p1236_p6 }
  0x30   :  { %p1239_p9 = pnand %p1238_p8, %p1232_p5 }
  0x32   :  { %1242 = shalt.err (!%p1239_p9)
}
  0x33   :  { %60 = dma.hbm_to_vmem [thread:$0]  %s1440_s6, 2048, %s55_s16, [#allocation6], %s1272_s19, %s1272_s19, %s1273_s20  }
  0x34   :  { %1265 = dma.done.wait [#allocation3], 1024  }
  0x35   :  { %1266 = vsyncadd [#allocation3], 4294966272 }
  0x36   :  { %1267 = dma.done.wait [#allocation6], 6144  }
  0x37   :  { %1268 = vsyncadd [#allocation6], 4294961152  ;;  %v1278_v0 = vmov 0   ;;  %v1115_v1 = vld [vmem:[#allocation2 + $0xc] ss:$16 sps:$4 sm:$0xff]   ;;  %v75_v5 = vld [vmem:[%s1434_s0] sm:$0xff]  ;;  %v87_v44 = vlaneseq }
  0x38   :  { %224 = vmatprep.mubr.bf16.mxu1 %v1278_v0  ;;  %183 = vmatprep.mubr.bf16.mxu0 %v1278_v0  ;;  %v1117_v2 = vld [vmem:[#allocation2 + $0x8] ss:$16 sps:$4 sm:$0xff]   ;;  %v1118_v3 = vld [vmem:[#allocation2 + $0x2c] ss:$16 sps:$4 sm:$0xff]   ;;  %v1121_v6 = vld [vmem:[#allocation2 + $0x4] ss:$16 sps:$4 sm:$0xff]   ;;  %v76_v10 = vpack.c.bf16 %v75_v5, %v75_v5 }
  0x39   :  { %192 = vmatprep.subr.bf16.mxu1 %v1115_v1  ;;  %v1120_v4 = vld [vmem:[#allocation2 + $0x28] ss:$16 sps:$4 sm:$0xff]   ;;  %v1123_v7 = vld [vmem:[#allocation2] ss:$16 sps:$4 sm:$0xff]   ;;  %151 = vmatprep.subr.bf16.mxu0 %v1121_v6  ;;  %v1124_v8 = vld [vmem:[#allocation2 + $0x24] ss:$16 sps:$4 sm:$0xff]  }
  0x3a   :  { %193 = vmatpush1.bf16.msra.mxu1 %v1117_v2  ;;  %v1126_v9 = vld [vmem:[#allocation2 + $0x20] ss:$16 sps:$4 sm:$0xff]   ;;  %152 = vmatpush1.bf16.msra.mxu0 %v1123_v7  ;;  %vm147_vm0 = vcmask 261120   ;;  %v1129_v13 = vld [vmem:[#allocation5 + $0xc8] sm:$0xff]   ;;  %v1133_v17 = vld [vmem:[#allocation5 + $0xd8] sm:$0xff]   ;;  %v1279_v32 = vmov 0.0  }
  0x3b   :  { %194 = vmatprep.subr.bf16.mxu1 %v1118_v3  ;;  %v1127_v11 = vld [vmem:[#allocation5 + $0xc0] sm:$0xff]   ;;  %153 = vmatprep.subr.bf16.mxu0 %v1124_v8  ;;  %v1130_v14 = vld [vmem:[#allocation5 + $0x88] sm:$0xff]   ;;  %v1131_v15 = vld [vmem:[#allocation5 + $0xd0] sm:$0xff]   ;;  %v88_v45 = vshrl.u32 %v87_v44, 7  ;;  %vm1280_vm1 = vmmov 0   ;;  %vm829_vm2 = vcmask 31744  }
  0x3c   :  { %v1128_v12 = vld [vmem:[#allocation5 + $0x80] sm:$0xff]   ;;  %v1132_v16 = vld [vmem:[#allocation5 + $0x90] sm:$0xff]   ;;  %v1134_v18 = vld [vmem:[#allocation5 + $0x98] sm:$0xff]   ;;  %vm831_vm3 = vcmask 39936   ;;  %vm834_vm4 = vcmask 48128   ;;  %vm911_vm5 = vcmask 64512  }
  0x3d   :  { %v1135_v19 = vld [vmem:[#allocation5 + $0xe0] sm:$0xff]   ;;  %v1137_v21 = vld [vmem:[#allocation5 + $0xe8] sm:$0xff]   ;;  %v1139_v23 = vld [vmem:[#allocation5 + $0xf0] sm:$0xff]   ;;  %v97_v46 = vsub.s32 2, %v88_v45  ;;  %v101_v48 = vsub.s32 3, %v88_v45  ;;  %v89_v49 = vsub.s32 0, %v88_v45 }
  0x3e   :  { %195 = vmatpush1.bf16.msra.mxu1 %v1120_v4  ;;  %154 = vmatpush1.bf16.msra.mxu0 %v1126_v9  ;;  %v1136_v20 = vld [vmem:[#allocation5 + $0xa0] sm:$0xff]   ;;  %v1138_v22 = vld [vmem:[#allocation5 + $0xa8] sm:$0xff]   ;;  %v1140_v24 = vld [vmem:[#allocation5 + $0xb0] sm:$0xff]   ;;  %v93_v51 = vsub.s32 1, %v88_v45 }
  0x3f   :  { %1017 = vmatprep.subr.bf16.mxu1 %v1127_v11  ;;  %v1141_v25 = vld [vmem:[#allocation5 + $0xf8] sm:$0xff]   ;;  %v1143_v27 = vld [vmem:[#allocation5 + $0x40] sm:$0xff]   ;;  %v1145_v29 = vld [vmem:[#allocation5 + $0x48] sm:$0xff]  }
  0x40   :  { %v1142_v26 = vld [vmem:[#allocation5 + $0xb8] sm:$0xff]   ;;  %v1144_v28 = vld [vmem:[#allocation5] sm:$0xff]   ;;  %995 = vmatprep.subr.bf16.mxu0 %v1143_v27  ;;  %v1146_v30 = vld [vmem:[#allocation5 + $0x8] sm:$0xff]  }
  0x41   :  { %938 = vmatmul.mubr.msk.bf16.vlgmr.msra.gmra.mrb[0].mxu1 %vm147_vm0, %v76_v10  ;;  %937 = vmatmul.mubr.msk.bf16.vlgmr.msra.gmra.mrb[0].mxu0 %vm147_vm0, %v76_v10  ;;  %v1147_v31 = vld [vmem:[#allocation5 + $0x50] sm:$0xff]   ;;  %v1149_v34 = vld [vmem:[#allocation5 + $0x58] sm:$0xff]   ;;  %v1151_v36 = vld [vmem:[#allocation5 + $0x60] sm:$0xff]  }
  0x42   :  { %1018 = vmatpush3.bf16.msra.mxu1 %v1128_v12  ;;  %996 = vmatpush3.bf16.msra.mxu0 %v1144_v28  ;;  %v1148_v33 = vld [vmem:[#allocation5 + $0x10] sm:$0xff]   ;;  %v1150_v35 = vld [vmem:[#allocation5 + $0x18] sm:$0xff]   ;;  %v1152_v37 = vld [vmem:[#allocation5 + $0x20] sm:$0xff]  }
  0x43   :  { %1019 = vmatprep.subr.bf16.mxu1 %v1129_v13  ;;  %997 = vmatprep.subr.bf16.mxu0 %v1145_v29  ;;  %v1153_v38 = vld [vmem:[#allocation5 + $0x68] sm:$0xff]   ;;  %v1155_v40 = vld [vmem:[#allocation5 + $0x70] sm:$0xff]   ;;  %v1157_v42 = vld [vmem:[#allocation5 + $0x78] sm:$0xff]  }
  0x44   :  { %v1154_v39 = vld [vmem:[#allocation5 + $0x28] sm:$0xff]   ;;  %v1156_v41 = vld [vmem:[#allocation5 + $0x30] sm:$0xff]   ;;  %v1158_v43 = vld [vmem:[#allocation5 + $0x38] sm:$0xff]  }
  0x45   :  { %v85_v47 = vld [vmem:[%s1437_s3] sm:$0xf]  ;;  %v1160_v12 = vld [vmem:[#allocation7 + $0x48] sm:$0xff]   ;;  %v1161_v13 = vld [vmem:[#allocation7 + $0x50] sm:$0xff]  }
  0x46   :  { %1020 = vmatpush3.bf16.msra.mxu1 %v1130_v14  ;;  %998 = vmatpush3.bf16.msra.mxu0 %v1146_v30  ;;  %v98_v50 = vrot.slane %v85_v47, %v97_v46  ;;  %v102_v52 = vrot.slane %v85_v47, %v101_v48  ;;  %v90_v54 = vrot.slane %v85_v47, %v89_v49  ;;  %v1159_v7 = vld [vmem:[#allocation7 + $0x40] sm:$0xff]   ;;  %v1162_v14 = vld [vmem:[#allocation7 + $0x58] sm:$0xff]  }
  0x47   :  { %1021 = vmatprep.subr.bf16.mxu1 %v1131_v15  ;;  %999 = vmatprep.subr.bf16.mxu0 %v1147_v31  ;;  %v94_v57 = vrot.slane %v85_v47, %v93_v51  ;;  %v1163_v15 = vld [vmem:[#allocation7 + $0x60] sm:$0xff]  }
  0x48   :  { %v957_v28 = vld [vmem:[%s1439_s5 + $0x1] ss:$0 sm:$0xff] }
  0x49   :  { %v984_v46 = vld [vmem:[%s1441_s7 + $0x1] ss:$0 sm:$0xff] }
  0x4a   :  { %1022 = vmatpush3.bf16.msra.mxu1 %v1132_v16  ;;  %1000 = vmatpush3.bf16.msra.mxu0 %v1148_v33  ;;  %v1164_v16 = vld [vmem:[#allocation7 + $0x68] sm:$0xff]  }
  0x4b   :  { %1023 = vmatprep.subr.bf16.mxu1 %v1133_v17  ;;  %1001 = vmatprep.subr.bf16.mxu0 %v1149_v34  ;;  %v1165_v17 = vld [vmem:[#allocation7 + $0x70] sm:$0xff]  }
  0x4e   :  { %1024 = vmatpush3.bf16.msra.mxu1 %v1134_v18  ;;  %1002 = vmatpush3.bf16.msra.mxu0 %v1150_v35  ;;  %v1166_v18 = vld [vmem:[#allocation7 + $0x78] sm:$0xff]  }
  0x4f   :  { %1025 = vmatprep.subr.bf16.mxu1 %v1135_v19  ;;  %1003 = vmatprep.subr.bf16.mxu0 %v1151_v36  ;;  %v1167_v19 = vld [vmem:[#allocation7] sm:$0xff]  }
  0x50   :  { %v939_v36 = vld [vmem:[%s1439_s5] ss:$0 sm:$0xff] }
  0x52   :  { %1026 = vmatpush3.bf16.msra.mxu1 %v1136_v20  ;;  %1004 = vmatpush3.bf16.msra.mxu0 %v1152_v37  ;;  %v1168_v20 = vld [vmem:[#allocation7 + $0x8] sm:$0xff]  }
  0x53   :  { %1027 = vmatprep.subr.bf16.mxu1 %v1137_v21  ;;  %1005 = vmatprep.subr.bf16.mxu0 %v1153_v38  ;;  %v1169_v21 = vld [vmem:[#allocation7 + $0x10] sm:$0xff]  }
  0x56   :  { %1028 = vmatpush3.bf16.msra.mxu1 %v1138_v22  ;;  %1006 = vmatpush3.bf16.msra.mxu0 %v1154_v39  ;;  %v1170_v22 = vld [vmem:[#allocation7 + $0x18] sm:$0xff]  }
  0x57   :  { %1029 = vmatprep.subr.bf16.mxu1 %v1139_v23  ;;  %1007 = vmatprep.subr.bf16.mxu0 %v1155_v40  ;;  %v1171_v23 = vld [vmem:[#allocation7 + $0x20] sm:$0xff]  }
  0x5a   :  { %1030 = vmatpush3.bf16.msra.mxu1 %v1140_v24  ;;  %1008 = vmatpush3.bf16.msra.mxu0 %v1156_v41  ;;  %v1172_v24 = vld [vmem:[#allocation7 + $0x28] sm:$0xff]  }
  0x5b   :  { %1031 = vmatprep.subr.bf16.mxu1 %v1141_v25  ;;  %1009 = vmatprep.subr.bf16.mxu0 %v1157_v42  ;;  %v1173_v25 = vld [vmem:[#allocation7 + $0x30] sm:$0xff]  }
  0x5e   :  { %1032 = vmatpush3.bf16.msra.mxu1 %v1142_v26  ;;  %1010 = vmatpush3.bf16.msra.mxu0 %v1158_v43  ;;  %v1174_v26 = vld [vmem:[#allocation7 + $0x38] sm:$0xff]  }
  0x5f   :  { %1079 = vmatprep.subr.bf16.mxu1 %v1279_v32  ;;  %1059 = vmatprep.subr.bf16.mxu0 %v1279_v32 }
 0x114   :  { %v226_v53 = vpop.f32.mrb[0].mxu1  ;;  %v185_v62 = vpop.f32.mrb[0].mxu0 }
 0x115   :  { %v227_v55 = vadd.f32 %v226_v53, %v98_v50  ;;  %v228_v56 = vpop.f32.mrb[1].mxu1  ;;  %v186_v0 = vadd.f32 %v185_v62, %v90_v54  ;;  %v187_v1 = vpop.f32.mrb[1].mxu0 }
 0x116   :  { %v229_v58 = vadd.f32 %v228_v56, %v102_v52  ;;  %v230_v59 = vpop.f32.mrb[2].mxu1  ;;  %v188_v2 = vadd.f32 %v187_v1, %v94_v57  ;;  %v189_v3 = vpop.f32.mrb[2].mxu0  ;;  %v974_v56 = vld [vmem:[%s1441_s7] ss:$0 sm:$0xff]  ;;  %s1281_s7 = smov [#allocation8]  }
 0x117   :  { %v235_v60 = vmax.f32 %v227_v55, 0.0  ;;  %v231_v61 = vpop.f32.mrb[3].mxu1  ;;  %v233_v5 = vmax.f32 %v186_v0, 0.0  ;;  %v190_v6 = vpop.f32.mrb[3].mxu0  ;;  %v833_v0 = vld [vmem:[%s1442_s8] sm:$0xff]  ;;  %s919_s16 = sshll.u32 %s1281_s7, 4  ;;  %s920_s16 = int_to_ptr.vmem [resolvable:$true] %s919_s16 }
 0x118   :  { %v236_v63 = vmax.f32 %v229_v58, 0.0  ;;  %v234_v9 = vmax.f32 %v188_v2, 0.0  ;;  %v822_v58 = vld [vmem:[%s1435_s1] sm:$0xff]  ;;  %s1243_s1 = scalar_lea.vmem %s920_s16, 128  ;;  %p1248_p11 = scmp.lt.s32.totalorder %s920_s16, %s920_s16 }
 0x119   :  { %v415_v8 = vpack.c.bf16 %v235_v60, %v235_v60  ;;  %v237_v10 = vpack.c.bf16 %v233_v5, %v233_v5  ;;  %p1244_p10 = scmp.ne.s32.totalorder %s920_s16, %s1243_s1  ;;  %p1249_p12 = scmp.lt.s32.totalorder %s1243_s1, %s1243_s1 }
 0x11a   :  { %v416_v4 = vpack.c.bf16 %v236_v63, %v236_v63  ;;  %v238_v11 = vpack.c.bf16 %v234_v9, %v234_v9 }
 0x11b   :  { %p1250_p13 = por %p1249_p12, %p1248_p11 }
 0x11c   :  { %586 = vmatprep.mubr.bf16.mxu1 %v416_v4  ;;  %406 = vmatprep.mubr.bf16.mxu0 %v238_v11 }
 0x11d   :  { %587 = vmatmul.mubr.bf16.vlgmr.msra.gmra.mrb[4].mxu1 %v415_v8  ;;  %407 = vmatmul.mubr.bf16.vlgmr.msra.gmra.mrb[4].mxu0 %v237_v10  ;;  %p1251_p0 = pnand %p1250_p13, %p1244_p10 }
 0x11e   :  { %1080 = vmatpush3.bf16.msra.mxu1 %v1159_v7  ;;  %1095 = vmatprep.mubr.msk.bf16.mxu1 %vm1280_vm1, %v1279_v32 }
 0x11f   :  { %1081 = vmatprep.subr.bf16.mxu1 %v1279_v32  ;;  %1075 = vmatprep.mubr.msk.bf16.mxu0 %vm1280_vm1, %v1279_v32 }
 0x120   :  { %1060 = vmatpush3.bf16.msra.mxu0 %v1167_v19 }
 0x121   :  { %1061 = vmatprep.subr.bf16.mxu0 %v1279_v32 }
 0x122   :  { %1082 = vmatpush3.bf16.msra.mxu1 %v1160_v12 }
 0x123   :  { %1083 = vmatprep.subr.bf16.mxu1 %v1279_v32 }
 0x124   :  { %1062 = vmatpush3.bf16.msra.mxu0 %v1168_v20 }
 0x125   :  { %1063 = vmatprep.subr.bf16.mxu0 %v1279_v32 }
 0x126   :  { %1084 = vmatpush3.bf16.msra.mxu1 %v1161_v13 }
 0x127   :  { %1085 = vmatprep.subr.bf16.mxu1 %v1279_v32 }
 0x128   :  { %1064 = vmatpush3.bf16.msra.mxu0 %v1169_v21 }
 0x129   :  { %1065 = vmatprep.subr.bf16.mxu0 %v1279_v32 }
 0x12a   :  { %1086 = vmatpush3.bf16.msra.mxu1 %v1162_v14 }
 0x12b   :  { %1087 = vmatprep.subr.bf16.mxu1 %v1279_v32 }
 0x12c   :  { %1066 = vmatpush3.bf16.msra.mxu0 %v1170_v22 }
 0x12d   :  { %1067 = vmatprep.subr.bf16.mxu0 %v1279_v32 }
 0x12e   :  { %1088 = vmatpush3.bf16.msra.mxu1 %v1163_v15 }
 0x12f   :  { %1089 = vmatprep.subr.bf16.mxu1 %v1279_v32 }
 0x130   :  { %1068 = vmatpush3.bf16.msra.mxu0 %v1171_v23 }
 0x131   :  { %1069 = vmatprep.subr.bf16.mxu0 %v1279_v32 }
 0x132   :  { %1090 = vmatpush3.bf16.msra.mxu1 %v1164_v16 }
 0x133   :  { %1091 = vmatprep.subr.bf16.mxu1 %v1279_v32 }
 0x134   :  { %1070 = vmatpush3.bf16.msra.mxu0 %v1172_v24 }
 0x135   :  { %1071 = vmatprep.subr.bf16.mxu0 %v1279_v32 }
 0x136   :  { %1092 = vmatpush3.bf16.msra.mxu1 %v1165_v17 }
 0x137   :  { %1093 = vmatprep.subr.bf16.mxu1 %v1279_v32 }
 0x138   :  { %1072 = vmatpush3.bf16.msra.mxu0 %v1173_v25 }
 0x139   :  { %1073 = vmatprep.subr.bf16.mxu0 %v1279_v32 }
 0x13a   :  { %1094 = vmatpush3.bf16.msra.mxu1 %v1166_v18 }
 0x13c   :  { %1074 = vmatpush3.bf16.msra.mxu0 %v1174_v26 }
 0x13d   :  { %1099 = vmatprep.subr.mxu0 %v1279_v32 }
 0x1f0   :  { %v1033_v27 = vpop.f32.mrb[4].mxu1  ;;  %v1011_v34 = vpop.f32.mrb[4].mxu0 }
 0x1f1   :  { %v1034_v29 = vpop.f32.mrb[5].mxu1  ;;  %v1012_v37 = vpop.f32.mrb[5].mxu0 }
 0x1f2   :  { %v1035_v30 = vadd.f32 %v1034_v29, %v1033_v27  ;;  %v1036_v31 = vpop.f32.mrb[6].mxu1  ;;  %v1013_v38 = vadd.f32 %v1012_v37, %v1011_v34  ;;  %v1014_v39 = vpop.f32.mrb[6].mxu0 }
 0x1f3   :  { %v1037_v33 = vpop.f32.mrb[7].mxu1  ;;  %v1015_v41 = vpop.f32.mrb[7].mxu0 }
 0x1f4   :  { %v589_v35 = vadd.f32 %v1035_v30, %v957_v28  ;;  %v409_v42 = vadd.f32 %v1013_v38, %v939_v36 }
 0x1f6   :  { %v594_v40 = vmax.f32 %v589_v35, 0.0  ;;  %v414_v44 = vmax.f32 %v409_v42, 0.0 }
 0x1f8   :  { %v707_v43 = vpack.c.bf16 %v594_v40, %v594_v40  ;;  %v595_v45 = vpack.c.bf16 %v414_v44, %v414_v44 }
 0x1fa   :  { %1096 = vmatmul.mubr.bf16.vlgmr.msra.gmra.mrb[8].mxu1 %v707_v43  ;;  %1076 = vmatmul.mubr.bf16.vlgmr.msra.gmra.mrb[8].mxu0 %v595_v45 }
 0x1fb   :  { %1101 = vmatprep.mubr.msk.f32.mxu0 %vm1280_vm1, %v1279_v32 }
 0x2cd   :  { %v815_v47 = vpop.f32.mrb[8].mxu1  ;;  %v701_v52 = vpop.f32.mrb[8].mxu0 }
 0x2ce   :  { %v1097_v48 = vpop.f32.mrb[9].mxu1  ;;  %v816_v49 = vadd.f32 %v984_v46, %v815_v47  ;;  %v1077_v53 = vpop.f32.mrb[9].mxu0  ;;  %v702_v32 = vadd.f32 %v974_v56, %v701_v52 }
 0x2cf   :  { %v818_v50 = vpop.f32.mrb[10].mxu1  ;;  %v704_v54 = vpop.f32.mrb[10].mxu0 }
 0x2d0   :  { %v1098_v51 = vpop.f32.mrb[11].mxu1  ;;  %826 = vrot.lane.b32.xlu0 %v816_v49, %s1273_s20  ;;  %v1078_v55 = vpop.f32.mrb[11].mxu0  ;;  %1175 = vtanh.f32 %v702_v32 }
 0x2da   :  { %v1176_v57 = vpop.eup %1175 }
 0x2db   :  { %v823_v59 = vsub.f32 %v822_v58, %v1176_v57 }
 0x2dd   :  { %v824_v60 = vmul.f32 %v823_v59, %v823_v59 }
 0x342   :  { %v827_v61 = vpop.permute.xlu0 %826 }
 0x343   :  { %v830_v62 = vsel %vm829_vm2, %v824_v60, %v827_v61 }
 0x344   :  { %v832_v63 = vsel %vm831_vm3, %v830_v62, 1.0 }
 0x345   :  { %1100 = vmatpush3.xpose.msk.msra.mxu0 %vm834_vm4, %v832_v63 }
 0x348   :  { %1102 = vmatmul.mubr.msk.f32.vlgmr.msra.gmra.mrb[12].mxu0 %vm834_vm4, %v833_v0 }
 0x41b   :  { %v907_v1 = vpop.f32.mrb[12].mxu0 }
 0x41c   :  { %v1103_v2 = vpop.f32.mrb[13].mxu0  ;;  %912 = vst.msk [vmem:[#allocation8] sm:$0xff] %vm911_vm5, %v907_v1 }
 0x41d   :  { %1254 = shalt.err (!%p1251_p0)
}
 0x41e   :  { %s1255_s21 = scalar_lea.hbm %s1443_s9, 128 }
 0x41f   :  { %p1256_p1 = scmp.ne.s32.totalorder %s1443_s9, %s1255_s21  ;;  %p1259_p2 = scmp.lt.u32.totalorder %s1255_s21, %s1443_s9 }
 0x421   :  { %p1261_p3 = pnand %p1259_p2, %p1256_p1 }
 0x423   :  { %1264 = shalt.err (!%p1261_p3)
}
 0x424   :  { %922 = dma.vmem_to_hbm [thread:$0]  %s920_s16, 128, %s1443_s9, [#allocation4]  }
 0x425   :  { %1269 = dma.done.wait [#allocation4], 128  }
 0x426   :  { %1270 = vsyncadd [#allocation4], 4294967168 }
 0x427   :  { %926 = vsyncpa [#allocation3], 1 }
 0x428   :  { %927 = vsyncpa [#allocation6], 1 }
 0x429   :  { %928 = vsyncpa [#allocation4], 1 }

</bundles_post_ra>
